<compile_context>
chip_gen: v7x
topology: tpu7x:2x2x1
jax: 0.10.0
libtpu: 0.0.40
codegen_flags: <defaults>
</compile_context>

<pallas_src>
import functools
import sys

import jax
import jax.numpy as jnp
from jax.experimental import pallas as pl
from jax.experimental.pallas import tpu as pltpu


# ---------------------------------------------------------------------------
# Kernels
# ---------------------------------------------------------------------------

def attention_kernel(x_ref, mem_ref, memt_ref, a_ref, c_ref, bias_ref, out_ref,
                     *, mem_dim, out_dim):
    """General path. Folded params: A = scale*Wq@Wk^T, C = Wv@Wo, bias rows packed."""
    x = x_ref[...]                                   # (Bb, hidden)
    b = bias_ref[...]                                # (2, P): row 0 = c, row 1 = b_out

    # s = x @ A + c   (query chain fully folded; dkv**-0.5 baked into A and c)
    s = jnp.dot(x, a_ref[...], preferred_element_type=jnp.float32) + b[0:1, :mem_dim]
    # scores = s @ mem^T   (memory pre-transposed in the wrapper -> plain MXU dot)
    scores = jnp.dot(s, memt_ref[...], preferred_element_type=jnp.float32)   # (Bb, L)

    # NOTE: reference adds pad_mask * sys.float_info.min == +0.0 in fp32 -> removed.
    # Q·bk / bq·bk per-row constants are softmax shift-invariant -> removed.

    # softmax over L in f32
    m = jnp.max(scores, axis=-1, keepdims=True)
    e = jnp.exp(scores - m)
    w = e / jnp.sum(e, axis=-1, keepdims=True)       # exact divide keeps 1e-5 tolerance

    # out = (w @ mem) @ C + b_out   (V never materialized; sum_j w_j == 1)
    wm = jnp.dot(w, mem_ref[...], preferred_element_type=jnp.float32)        # (Bb, mem_dim)
    out = jnp.dot(wm, c_ref[...], preferred_element_type=jnp.float32) + b[1:2, :out_dim]
    out_ref[...] = out.astype(out_ref.dtype)


def attention_step_kernel(x_ref, m_ref, vo_ref, bias_ref, out_ref, *, L, out_dim):
    """Decode-step path: memory-side matmuls precomputed once per memory (2 MXU dots)."""
    b = bias_ref[...]                                # (2, P): row 0 = mb, row 1 = b_out
    scores = jnp.dot(x_ref[...], m_ref[...],
                     preferred_element_type=jnp.float32) + b[0:1, :L]        # (Bb, L)
    m = jnp.max(scores, axis=-1, keepdims=True)
    e = jnp.exp(scores - m)
    w = e / jnp.sum(e, axis=-1, keepdims=True)
    out = jnp.dot(w, vo_ref[...], preferred_element_type=jnp.float32) + b[1:2, :out_dim]
    out_ref[...] = out.astype(out_ref.dtype)


# ---------------------------------------------------------------------------
# Parameter folding (one-time, outside the kernel)
# ---------------------------------------------------------------------------

def _pack_rows(r0, r1):
    """Pack two (1, n) bias rows into one (2, P) array (one DMA instead of two)."""
    p = max(r0.shape[1], r1.shape[1])
    out = jnp.zeros((2, p), jnp.float32)
    out = out.at[0, :r0.shape[1]].set(r0[0])
    out = out.at[1, :r1.shape[1]].set(r1[0])
    return out


def fold_params(params):
    """Constant-fold the Q/K and V/O projection chains (weights stored (in, out))."""
    wq, bq, wk, bk, wv, bv, wo, bo = params
    dkv = wq.shape[1]
    scale = jnp.float32(dkv) ** jnp.float32(-0.5)
    A = (scale * wq) @ wk.T            # (hidden, mem_dim)
    c = (scale * bq) @ wk.T            # (1, mem_dim)  -- varies over L via mem: keep
    C = wv @ wo                        # (mem_dim, out_dim)
    b_out = bv @ wo + bo               # (1, out_dim)
    # Q·bk / bq·bk per-row constants dropped (softmax shift-invariant).
    return A, c, C, b_out, _pack_rows(c, b_out)


def precompute_memory_tables(memory, folded):
    """Amortize all memory-side matmuls when memory is fixed across a decode loop."""
    A, c, C, b_out, _ = folded
    M = A @ memory.T                   # (hidden, L):  x@M == (x@A)@mem^T
    mb = c @ memory.T                  # (1, L)
    VO = memory @ C                    # (L, out_dim): (w@mem)@C == w@VO
    return M, VO, _pack_rows(mb, b_out), memory.shape[0], C.shape[1]


# ---------------------------------------------------------------------------
# Wrappers
# ---------------------------------------------------------------------------

def attention_forward(x, memory, folded, *, b_block=None):
    """Batched entry. x: (B, hidden); memory: (L, memory_dim) -> (B, output_dim).

    b_block=None : gridless single invocation (best for small B; no grid overhead).
    b_block=k    : 1-D "parallel" grid over B in blocks of k rows (k % 8 == 0), so
                   large batches shard across both TensorCores on v7x.
    """
    A, _, C, _, bias_pack = folded
    B, hidden = x.shape
    L, mem_dim = memory.shape
    out_dim = C.shape[1]
    mem_t = memory.T                   # transpose once in the wrapper, not in-kernel
    kern = functools.partial(attention_kernel, mem_dim=mem_dim, out_dim=out_dim)
    args = (x, memory, mem_t, A, C, bias_pack)
    out_shape = jax.ShapeDtypeStruct((B, out_dim), jnp.float32)

    if b_block is None or b_block >= B:
        vmem = pl.BlockSpec(memory_space=pltpu.MemorySpace.VMEM)
        return pl.pallas_call(
            kern, out_shape=out_shape,
            in_specs=[vmem] * len(args), out_specs=vmem,
        )(*args)

    assert B % b_block == 0 and b_block % 8 == 0, (B, b_block)
    full = lambda a: pl.BlockSpec(a.shape, lambda i: (0, 0))
    return pl.pallas_call(
        kern,
        out_shape=out_shape,
        grid=(B // b_block,),
        in_specs=[pl.BlockSpec((b_block, hidden), lambda i: (i, 0)),
                  full(memory), full(mem_t), full(A), full(C), full(bias_pack)],
        out_specs=pl.BlockSpec((b_block, out_dim), lambda i: (i, 0)),
        compiler_params=pltpu.CompilerParams(dimension_semantics=("parallel",)),
    )(*args)


def attention_module_forward(x, memory, folded):
    """Module-equivalent path: single (1, hidden) query -> (1, 1, output_dim)."""
    return attention_forward(x.reshape(1, -1), memory, folded).reshape(1, 1, -1)


def attention_decode_step(x, tables):
    """Per-decode-step entry (memory fixed). x: (B, hidden) -> (B, output_dim)."""
    M, VO, bias_pack, L, out_dim = tables
    kern = functools.partial(attention_step_kernel, L=L, out_dim=out_dim)
    vmem = pl.BlockSpec(memory_space=pltpu.MemorySpace.VMEM)
    return pl.pallas_call(
        kern,
        out_shape=jax.ShapeDtypeStruct((x.shape[0], out_dim), jnp.float32),
        in_specs=[vmem] * 4, out_specs=vmem,
    )(x, M, VO, bias_pack)


# ---------------------------------------------------------------------------
# Pure-JAX reference (original unfused / unfolded math)
# ---------------------------------------------------------------------------

def reference_forward(x, memory, params):
    wq, bq, wk, bk, wv, bv, wo, bo = params
    dkv = wq.shape[1]
    q = (x @ wq + bq) * (dkv ** -0.5)
    k = memory @ wk + bk
    v = memory @ wv + bv
    scores = q @ k.T
    any_zero = memory.sum(axis=1)
    pad_mask = jnp.where(any_zero == 0.0, 1.0, 0.0)[None, :]
    scores = scores + pad_mask.astype(jnp.float32) * jnp.float32(sys.float_info.min)
    w = jax.nn.softmax(scores, axis=-1)
    feat = w @ v
    return feat @ wo + bo


if __name__ == "__main__":
    hidden_dim = 32
    memory_dim = 32
    attention_dkv = 32
    output_dim = 32
    L = 8  # memory length (<= max_length)

    key = jax.random.PRNGKey(0)
    ks = jax.random.split(key, 12)

    # deterministic synthetic parameters (weights stored pre-transposed: (in, out))
    wq = 0.1 * jax.random.normal(ks[0], (hidden_dim, attention_dkv), jnp.float32)
    bq = 0.01 * jax.random.normal(ks[1], (1, attention_dkv), jnp.float32)
    wk = 0.1 * jax.random.normal(ks[2], (memory_dim, attention_dkv), jnp.float32)
    bk = 0.01 * jax.random.normal(ks[3], (1, attention_dkv), jnp.float32)
    wv = 0.1 * jax.random.normal(ks[4], (memory_dim, attention_dkv), jnp.float32)
    bv = 0.01 * jax.random.normal(ks[5], (1, attention_dkv), jnp.float32)
    wo = 0.1 * jax.random.normal(ks[6], (attention_dkv, output_dim), jnp.float32)
    bo = 0.01 * jax.random.normal(ks[7], (1, output_dim), jnp.float32)
    params = (wq, bq, wk, bk, wv, bv, wo, bo)
    folded = fold_params(params)       # one-time chain folding for the kernel path

    x = jax.random.normal(ks[8], (1, hidden_dim), jnp.float32)
    memory = jax.random.normal(ks[9], (L, memory_dim), jnp.float32)
    memory = memory.at[-2:, :].set(0.0)   # exercise the (no-op) pad-mask rows

    # --- module-equivalent single-query path (matches torch shape (1, 1, out)) ---
    out = jax.block_until_ready(attention_module_forward(x, memory, folded))
    ref = reference_forward(x, memory, params).reshape(1, 1, -1)
    assert out.shape == (1, 1, output_dim)
    assert jnp.allclose(out, ref, atol=1e-5, rtol=1e-5), (out, ref)

    # --- small-batch path: gridless, single invocation ---
    B = 8
    xb = jax.random.normal(ks[10], (B, hidden_dim), jnp.float32)
    out_b = jax.block_until_ready(attention_forward(xb, memory, folded))
    ref_b = reference_forward(xb, memory, params)
    assert out_b.shape == (B, output_dim)
    assert jnp.allclose(out_b, ref_b, atol=1e-5, rtol=1e-5), (out_b, ref_b)

    # --- large-batch path: 1-D parallel grid over B (shards across v7x's 2 TCs) ---
    Bb = 256
    xl = jax.random.normal(ks[11], (Bb, hidden_dim), jnp.float32)
    out_l = jax.block_until_ready(attention_forward(xl, memory, folded, b_block=128))
    ref_l = reference_forward(xl, memory, params)
    assert out_l.shape == (Bb, output_dim)
    assert jnp.allclose(out_l, ref_l, atol=1e-5, rtol=1e-5)

    # --- decode-loop path: memory-side matmuls amortized once per memory ---
    tables = precompute_memory_tables(memory, folded)
    for step in range(3):
        xs = jax.random.normal(jax.random.fold_in(key, step), (1, hidden_dim), jnp.float32)
        out_s = jax.block_until_ready(attention_decode_step(xs, tables))
        ref_s = reference_forward(xs, memory, params)
        assert jnp.allclose(out_s, ref_s, atol=1e-5, rtol=1e-5), (step, out_s, ref_s)

    print("KERNEL_OK")
</pallas_src>

<mosaic_0001>
module attributes {stable_mosaic.version = 11 : i64} {
  func.func @attention_kernel(%arg0: memref<1x32xf32, #tpu.memory_space<vmem>>, %arg1: memref<8x32xf32, #tpu.memory_space<vmem>>, %arg2: memref<32x8xf32, #tpu.memory_space<vmem>>, %arg3: memref<32x32xf32, #tpu.memory_space<vmem>>, %arg4: memref<32x32xf32, #tpu.memory_space<vmem>>, %arg5: memref<2x32xf32, #tpu.memory_space<vmem>>, %arg6: memref<1x32xf32, #tpu.memory_space<vmem>>) attributes {dimension_semantics = [], scalar_prefetch = 0 : i64, scratch_operands = 0 : i64, tpu.core_type = #tpu.core_type<tc>} {
    %c0 = arith.constant 0 : index
    %c0_0 = arith.constant 0 : index
    %0 = vector.load %arg0[%c0, %c0_0] : memref<1x32xf32, #tpu.memory_space<vmem>>, vector<1x32xf32>
    %c0_1 = arith.constant 0 : index
    %c0_2 = arith.constant 0 : index
    %1 = vector.load %arg5[%c0_1, %c0_2] : memref<2x32xf32, #tpu.memory_space<vmem>>, vector<2x32xf32>
    %c0_3 = arith.constant 0 : index
    %c0_4 = arith.constant 0 : index
    %2 = vector.load %arg3[%c0_3, %c0_4] : memref<32x32xf32, #tpu.memory_space<vmem>>, vector<32x32xf32>
    %cst = arith.constant dense<0.000000e+00> : vector<1x32xf32>
    %3 = tpu.matmul %0, %2, %cst {dimension_numbers = #tpu.dot_dimension_numbers<[1], [0], [0], [1], [0, 0, 1, 1], [], []>} : vector<1x32xf32>, vector<32x32xf32>, vector<1x32xf32> -> vector<1x32xf32>
    %4 = vector.extract_strided_slice %1 {offsets = [0, 0], sizes = [1, 32], strides = [1, 1]} : vector<2x32xf32> to vector<1x32xf32>
    %5 = arith.addf %3, %4 : vector<1x32xf32>
    %c0_5 = arith.constant 0 : index
    %c0_6 = arith.constant 0 : index
    %6 = vector.load %arg2[%c0_5, %c0_6] : memref<32x8xf32, #tpu.memory_space<vmem>>, vector<32x8xf32>
    %cst_7 = arith.constant dense<0.000000e+00> : vector<1x8xf32>
    %7 = tpu.matmul %5, %6, %cst_7 {dimension_numbers = #tpu.dot_dimension_numbers<[1], [0], [0], [1], [0, 0, 1, 1], [], []>} : vector<1x32xf32>, vector<32x8xf32>, vector<1x8xf32> -> vector<1x8xf32>
    %cst_8 = arith.constant dense<0xFF800000> : vector<1xf32>
    %8 = vector.multi_reduction <maximumf>, %7, %cst_8 [1] : vector<1x8xf32> to vector<1xf32>
    %9 = vector.shape_cast %8 : vector<1xf32> to vector<1x1xf32>
    %10 = vector.broadcast %9 : vector<1x1xf32> to vector<1x8xf32>
    %11 = arith.subf %7, %10 : vector<1x8xf32>
    %12 = math.exp %11 : vector<1x8xf32>
    %cst_9 = arith.constant dense<0.000000e+00> : vector<1xf32>
    %13 = vector.multi_reduction <add>, %12, %cst_9 [1] : vector<1x8xf32> to vector<1xf32>
    %14 = vector.shape_cast %13 : vector<1xf32> to vector<1x1xf32>
    %15 = vector.broadcast %14 : vector<1x1xf32> to vector<1x8xf32>
    %16 = arith.divf %12, %15 : vector<1x8xf32>
    %c0_10 = arith.constant 0 : index
    %c0_11 = arith.constant 0 : index
    %17 = vector.load %arg1[%c0_10, %c0_11] : memref<8x32xf32, #tpu.memory_space<vmem>>, vector<8x32xf32>
    %cst_12 = arith.constant dense<0.000000e+00> : vector<1x32xf32>
    %18 = tpu.matmul %16, %17, %cst_12 {dimension_numbers = #tpu.dot_dimension_numbers<[1], [0], [0], [1], [0, 0, 1, 1], [], []>} : vector<1x8xf32>, vector<8x32xf32>, vector<1x32xf32> -> vector<1x32xf32>
    %c0_13 = arith.constant 0 : index
    %c0_14 = arith.constant 0 : index
    %19 = vector.load %arg4[%c0_13, %c0_14] : memref<32x32xf32, #tpu.memory_space<vmem>>, vector<32x32xf32>
    %cst_15 = arith.constant dense<0.000000e+00> : vector<1x32xf32>
    %20 = tpu.matmul %18, %19, %cst_15 {dimension_numbers = #tpu.dot_dimension_numbers<[1], [0], [0], [1], [0, 0, 1, 1], [], []>} : vector<1x32xf32>, vector<32x32xf32>, vector<1x32xf32> -> vector<1x32xf32>
    %21 = vector.extract_strided_slice %1 {offsets = [1, 0], sizes = [1, 32], strides = [1, 1]} : vector<2x32xf32> to vector<1x32xf32>
    %22 = arith.addf %20, %21 : vector<1x32xf32>
    %c0_16 = arith.constant 0 : index
    %c0_17 = arith.constant 0 : index
    %23 = vector.load %arg6[%c0_16, %c0_17] : memref<1x32xf32, #tpu.memory_space<vmem>>, vector<1x32xf32>
    tpu.vector_store %arg6[%c0_16, %c0_17], %22 {strides = array<i32>} : memref<1x32xf32, #tpu.memory_space<vmem>>, vector<1x32xf32>,
    return
  }
}

</mosaic_0001>

<bundles_post_ra>
// kernel: tpu_custom_call.1
= control target key start
LH: loop header
LB: loop body
LE: loop exit
PB: predicated region body
PF: predicated region fallthrough
CT: control target
= control target key end

     0   :  { %11 = vsyncpa [#allocation3], 0  ;;  %s621_s0 = inlined_call_operand.vmem [shape: f32[1,32], index: 0, kind: input, shape index: {}]   ;;  %s622_s1 = inlined_call_operand.vmem [shape: f32[8,32], index: 1, kind: input, shape index: {}]   ;;  %s623_s2 = inlined_call_operand.vmem [shape: f32[32,8], index: 2, kind: input, shape index: {}]   ;;  %s624_s3 = inlined_call_operand.vmem [shape: f32[32,32], index: 3, kind: input, shape index: {}]   ;;  %s625_s4 = inlined_call_operand.hbm [shape: f32[32,32], index: 4, kind: input, shape index: {}]   ;;  %s626_s5 = inlined_call_operand.vmem [shape: f32[2,32], index: 5, kind: input, shape index: {}]   ;;  %s627_s6 = inlined_call_operand.hbm [shape: f32[1,32], index: 6, kind: output, shape index: {}]  }
   0x1   :  { %12 = vsyncpa [#allocation4], 0  ;;  %s515_s21 = smov [#allocation2]   ;;  %s467_s25 = scalar_lea.hbm %s625_s4, 512 }
   0x2   :  { %s26_s22 = sshll.u32 %s515_s21, 4  ;;  %p468_p0 = scmp.ne.s32.totalorder %s625_s4, %s467_s25  ;;  %s27_s22 = int_to_ptr.vmem [resolvable:$true] %s26_s22 }
   0x3   :  { %p471_p1 = scmp.lt.u32.totalorder %s467_s25, %s625_s4 }
   0x5   :  { %p473_p2 = pnand %p471_p1, %p468_p0 }
   0x7   :  { %476 = shalt.err (!%p473_p2)
}
   0x8   :  { %s477_s30 = scalar_lea.vmem %s27_s22, 512  ;;  %p482_p4 = scmp.lt.s32.totalorder %s27_s22, %s27_s22 }
   0x9   :  { %p478_p3 = scmp.ne.s32.totalorder %s27_s22, %s477_s30  ;;  %p483_p5 = scmp.lt.s32.totalorder %s477_s30, %s477_s30 }
   0xb   :  { %p484_p6 = por %p483_p5, %p482_p4 }
   0xd   :  { %p485_p7 = pnand %p484_p6, %p478_p3 }
   0xf   :  { %488 = shalt.err (!%p485_p7)
}
  0x10   :  { %s516_s7 = smov 128   ;;  %s517_s8 = smov 8  }
  0x11   :  { %32 = dma.hbm_to_vmem [thread:$0]  %s625_s4, 512, %s27_s22, [#allocation3], %s516_s7, %s516_s7, %s517_s8  }
  0x12   :  { %511 = dma.done.wait [#allocation3], 512  }
  0x13   :  { %512 = vsyncadd [#allocation3], 4294966784  ;;  %v518_v0 = vmov 0.0|0.0   ;;  %vm519_vm0 = vmmov 0   ;;  %v520_v1 = vmov 0.0   ;;  %v40_v2 = vld [vmem:[%s624_s3] sm:$0xff] }
  0x14   :  { %438 = vmatprep.subr.bf16.mxu0 %v518_v0  ;;  %408 = vmatprep.mubr.msk.f32.mxu0 %vm519_vm0, %v520_v1  ;;  %v41_v3 = vld [vmem:[%s624_s3 + $0x8] sm:$0xff]  ;;  %v42_v4 = vld [vmem:[%s624_s3 + $0x10] sm:$0xff]  ;;  %v43_v6 = vld [vmem:[%s624_s3 + $0x18] sm:$0xff]  ;;  %vm44_vm1 = vcmask 261120   ;;  %vm195_vm2 = vcmask 57344   ;;  %vm208_vm3 = vcmask 64512  }
  0x15   :  { %444 = vmatprep.subr.bf16.mxu1 %v518_v0  ;;  %419 = vmatprep.mubr.msk.f32.mxu1 %vm519_vm0, %v520_v1  ;;  %v439_v5 = vpack.c.bf16 %v41_v3, %v40_v2  ;;  %v118_v7 = vld [vmem:[%s623_s2] sm:$0xff]  ;;  %v119_v8 = vld [vmem:[%s623_s2 + $0x8] sm:$0xff]  ;;  %v442_v9 = vpack.c.bf16 %v43_v6, %v42_v4  ;;  %v120_v12 = vld [vmem:[%s623_s2 + $0x10] sm:$0xff]  ;;  %vm362_vm4 = vcmask 253952  }
  0x16   :  { %v445_v10 = vpack.c.bf16 %v119_v8, %v118_v7  ;;  %v38_v11 = vld [vmem:[%s621_s0] sm:$0x1]  ;;  %v121_v13 = vld [vmem:[%s623_s2 + $0x18] sm:$0xff]  ;;  %v283_v29 = vld [vmem:[#allocation2 + $0x8] sm:$0xff] }
  0x17   :  { %440 = vmatpush3.bf16.msra.mxu0 %v439_v5  ;;  %v448_v14 = vpack.c.bf16 %v121_v13, %v120_v12  ;;  %v39_v15 = vld [vmem:[%s626_s5] sm:$0x3]  ;;  %v284_v30 = vld [vmem:[#allocation2 + $0x10] sm:$0xff]  ;;  %v285_v32 = vld [vmem:[#allocation2 + $0x18] sm:$0xff] }
  0x18   :  { %441 = vmatprep.subr.bf16.mxu0 %v518_v0  ;;  %446 = vmatpush3.bf16.msra.mxu1 %v445_v10  ;;  %v207_v27 = vld [vmem:[%s622_s1] sm:$0xff]  ;;  %v454_v33 = vpack.c.bf16 %v285_v32, %v284_v30  ;;  %v287_v39 = vrot.slane %v39_v15, 1  ;;  %s521_s1 = smov [#allocation5]  }
  0x19   :  { %447 = vmatprep.subr.bf16.mxu1 %v518_v0  ;;  %v282_v28 = vld [vmem:[#allocation2] sm:$0xff]  ;;  %s370_s5 = sshll.u32 %s521_s1, 4  ;;  %s371_s5 = int_to_ptr.vmem [resolvable:$true] %s370_s5 }
  0x1a   :  { %v451_v31 = vpack.c.bf16 %v283_v29, %v282_v28  ;;  %s489_s29 = scalar_lea.vmem %s371_s5, 16  ;;  %s493_s30 = scalar_lea.vmem %s371_s5, 32 }
  0x1b   :  { %443 = vmatpush3.bf16.msra.mxu0 %v442_v9  ;;  %p490_p8 = scmp.ne.s32.totalorder %s371_s5, %s489_s29  ;;  %p494_p9 = scmp.lt.s32.totalorder %s371_s5, %s371_s5 }
  0x1c   :  { %422 = vmatprep.subr.mxu0 %v520_v1  ;;  %449 = vmatpush3.bf16.msra.mxu1 %v448_v14  ;;  %p495_p10 = scmp.lt.s32.totalorder %s493_s30, %s489_s29 }
  0x1d   :  { %450 = vmatprep.subr.bf16.mxu1 %v518_v0 }
  0x1e   :  { %409 = vmatmul.mubr.msk.f32.vlgmr.msra.gmra.mrb[0].mxu0 %vm44_vm1, %v38_v11  ;;  %p496_p11 = por %p495_p10, %p494_p9 }
  0x1f   :  { %424 = vmatprep.mubr.msk.f32.mxu0 %vm519_vm0, %v520_v1  ;;  %423 = vmatpush3.msra.mxu0 %v207_v27 }
  0x20   :  { %p497_p12 = pnand %p496_p11, %p490_p8 }
  0xf1   :  { %v114_v16 = vpop.f32.mrb[0].mxu0 }
  0xf2   :  { %v115_v17 = vadd.f32 %v114_v16, %v39_v15  ;;  %v410_v18 = vpop.f32.mrb[1].mxu0 }
  0xf4   :  { %420 = vmatmul.mubr.msk.f32.vlgmr.msra.gmra.mrb[0].mxu1 %vm44_vm1, %v115_v17 }
  0xf5   :  { %435 = vmatprep.mubr.msk.f32.mxu1 %vm519_vm0, %v520_v1  ;;  %452 = vmatpush3.bf16.msra.mxu1 %v451_v31 }
  0xf6   :  { %453 = vmatprep.subr.bf16.mxu1 %v518_v0 }
  0xf9   :  { %455 = vmatpush3.bf16.msra.mxu1 %v454_v33 }
 0x1c7   :  { %v191_v19 = vpop.f32.mrb[0].mxu1 }
 0x1c8   :  { %v421_v20 = vpop.f32.mrb[1].mxu1  ;;  %v196_v21 = vsel %vm195_vm2, %v191_v19, -inf }
 0x1c9   :  { %197 = vmax.xlane.f32.xlu0 %v196_v21 }
 0x256   :  { %v198_v22 = vpop.xlane.xlu0 %197 }
 0x257   :  { %v199_v23 = vsub.f32 %v191_v19, %v198_v22 }
 0x259   :  { %v200_v24 = vmul.f32 1.442695, %v199_v23 }
 0x25b   :  { %463 = vpow2.f32 %v200_v24 }
 0x265   :  { %v464_v25 = vpop.eup %463 }
 0x266   :  { %v202_v26 = vsel %vm195_vm2, %v464_v25, 0.0 }
 0x267   :  { %203 = vadd.xlane.f32.xlu0 %v202_v26 }
 0x2f4   :  { %v204_v34 = vpop.xlane.xlu0 %203 }
 0x2f5   :  { %465 = vrcp.f32 %v204_v34 }
 0x2ff   :  { %v466_v35 = vpop.eup %465 }
 0x300   :  { %v206_v36 = vmul.f32 %v466_v35, %v464_v25 }
 0x302   :  { %425 = vmatmul.mubr.msk.f32.vlgmr.msra.gmra.mrb[2].mxu0 %vm208_vm3, %v206_v36 }
 0x3d5   :  { %v278_v37 = vpop.f32.mrb[2].mxu0 }
 0x3d6   :  { %v426_v38 = vpop.f32.mrb[3].mxu0  ;;  %436 = vmatmul.mubr.msk.f32.vlgmr.msra.gmra.mrb[2].mxu1 %vm44_vm1, %v278_v37 }
 0x4a9   :  { %v358_v40 = vpop.f32.mrb[2].mxu1 }
 0x4aa   :  { %v359_v41 = vadd.f32 %v358_v40, %v287_v39  ;;  %v437_v42 = vpop.f32.mrb[3].mxu1 }
 0x4ac   :  { %363 = vst.msk [vmem:[#allocation5] sm:$0x1] %vm362_vm4, %v359_v41 }
 0x4ad   :  { %500 = shalt.err (!%p497_p12)
}
 0x4ae   :  { %s501_s9 = scalar_lea.hbm %s627_s6, 16 }
 0x4af   :  { %p502_p13 = scmp.ne.s32.totalorder %s627_s6, %s501_s9  ;;  %p505_p0 = scmp.lt.u32.totalorder %s501_s9, %s627_s6 }
 0x4b1   :  { %p507_p1 = pnand %p505_p0, %p502_p13 }
 0x4b3   :  { %510 = shalt.err (!%p507_p1)
}
 0x4b4   :  { %373 = dma.vmem_to_hbm [thread:$0]  %s371_s5, 16, %s627_s6, [#allocation4]  }
 0x4b5   :  { %513 = dma.done.wait [#allocation4], 16  }
 0x4b6   :  { %514 = vsyncadd [#allocation4], 4294967280 }
 0x4b7   :  { %377 = vsyncpa [#allocation3], 1 }
 0x4b8   :  { %378 = vsyncpa [#allocation4], 1 }

</bundles_post_ra>
